<compile_context>
chip_gen: v5e
topology: v5e:2x2
jax: 0.10.0
libtpu: 0.0.40
codegen_flags: <defaults>
</compile_context>

<pallas_src>
import functools

import jax
import jax.numpy as jnp
from jax.experimental import pallas as pl
from jax.experimental.pallas import tpu as pltpu

HIDDEN_SIZE = 128        # small stand-in for 768
NUM_LABELS = 2
BATCH = 12               # deliberately NOT a multiple of 16 to exercise tail masking
DEFAULT_TILE_B = 4096    # ~12 MiB/buffer at H=768 f32; double-buffers inside 48 MiB VMEM
_SINGLE_TILE_MAX = 256   # below this, one tile (padded to 16) is cheapest


def _round_up(x, m):
    return (x + m - 1) // m * m


# ---------------------------------------------------------------------------
# Fused kernel A (training path): per-sample CE loss of tanh(x @ W^T + b)
# Logits are computed transposed: [L, tile_b]  (classes on sublanes, batch on lanes).
# ---------------------------------------------------------------------------
def _fused_ce_kernel(x_ref, w_ref, b_ref, y_ref, out_ref, *, total_rows):
    tile_b = x_ref.shape[0]
    x = x_ref[...].astype(jnp.bfloat16)          # [tile_b, H]  (cast in-kernel, free)
    w = w_ref[...].astype(jnp.bfloat16)          # [L, H]
    # Contract the lane (H) dim of both operands (q@k^T pattern) -> [L, tile_b], f32 acc.
    logits = jax.lax.dot_general(
        w, x, (((1,), (1,)), ((), ())), preferred_element_type=jnp.float32)
    logits = jnp.tanh(logits + b_ref[...])                            # [L, tile_b] f32

    # Numerically stable cross-entropy over the (tiny) class/sublane axis.
    m = jnp.max(logits, axis=0, keepdims=True)                        # [1, tile_b]
    lse = m + jnp.log(jnp.sum(jnp.exp(logits - m), axis=0, keepdims=True))
    cls = jax.lax.broadcasted_iota(jnp.int32, logits.shape, 0)        # [L, tile_b]
    picked = jnp.sum(jnp.where(cls == y_ref[...], logits, 0.0),
                     axis=0, keepdims=True)                           # [1, tile_b]
    per_sample = lse - picked

    # Zero the out-of-batch lanes (padded tail / garbage rows of a partial x block).
    col = (jax.lax.broadcasted_iota(jnp.int32, per_sample.shape, 1)
           + pl.program_id(0) * tile_b)
    out_ref[...] = jnp.where(col < total_rows, per_sample, 0.0)       # lane-dense store


# ---------------------------------------------------------------------------
# Fused kernel B (inference path): argmax of tanh(x @ W^T + b)
# ---------------------------------------------------------------------------
def _fused_argmax_kernel(x_ref, w_ref, b_ref, out_ref):
    num_labels = w_ref.shape[0]
    x = x_ref[...].astype(jnp.bfloat16)
    w = w_ref[...].astype(jnp.bfloat16)
    logits = jax.lax.dot_general(
        w, x, (((1,), (1,)), ((), ())), preferred_element_type=jnp.float32)
    logits = jnp.tanh(logits + b_ref[...])                            # [L, tile_b] f32
    m = jnp.max(logits, axis=0, keepdims=True)                        # [1, tile_b]
    cls = jax.lax.broadcasted_iota(jnp.int32, logits.shape, 0)        # [L, tile_b]
    # First index attaining the max (matches jnp/torch argmax tie-breaking).
    idx = jnp.min(jnp.where(logits == m, cls, num_labels), axis=0, keepdims=True)
    out_ref[...] = idx.astype(jnp.int32)                              # [1, tile_b] int32


# ---------------------------------------------------------------------------
# Wrapper mirroring SequenceSummary.forward
# ---------------------------------------------------------------------------
def _choose_tile(batch, requested):
    if batch <= _SINGLE_TILE_MAX:
        # One tile; pad rows up to a 16-multiple (tiny copy) so the block tiles exactly.
        return _round_up(batch, 16), 1
    # Multi-tile: lane-dense [1, tile_b] outputs need tile_b % 128 == 0; cap at ~B/2 so
    # the "parallel" batch axis has >= 2 steps (both v7x TensorCores busy).
    half = _round_up(-(-batch // 2), 128)
    tb = max(128, min(_round_up(requested, 128), half))
    return tb, pl.cdiv(batch, tb)


def sequence_summary(hidden, weight, bias, labels=None, *, tile_b=DEFAULT_TILE_B):
    B, H = hidden.shape
    L, H2 = weight.shape
    assert H == H2

    tb, num_tiles = _choose_tile(B, tile_b)
    Bp = num_tiles * tb

    x = hidden                                  # native dtype; cast to bf16 in-kernel
    if num_tiles == 1 and Bp != B:
        x = jnp.pad(x, ((0, Bp - B), (0, 0)))   # tiny pad only in the small-batch regime
    w = weight                                  # [L, H], original layout
    b_col = bias.reshape(L, 1).astype(jnp.float32)

    grid = (num_tiles,)
    in_specs = [
        pl.BlockSpec((tb, H), lambda i: (i, 0)),   # hidden tile (partial last block OK)
        pl.BlockSpec((L, H), lambda i: (0, 0)),    # weight, resident
        pl.BlockSpec((L, 1), lambda i: (0, 0)),    # bias column, resident
    ]
    out_spec = pl.BlockSpec((1, tb), lambda i: (0, i))   # lane-dense output blocks
    cparams = pltpu.CompilerParams(
        dimension_semantics=("parallel",),
        vmem_limit_bytes=48 * 1024 * 1024,       # <= v7x 64 MiB physical; fine on v5e/v6e
    )
    base_bytes = B * H * hidden.dtype.itemsize + L * H * weight.dtype.itemsize + L * 4

    if labels is None:
        cost = pl.CostEstimate(flops=2 * B * H * L + 6 * B * L,
                               transcendentals=B * L,
                               bytes_accessed=base_bytes + Bp * 4)
        preds = pl.pallas_call(
            _fused_argmax_kernel,
            out_shape=jax.ShapeDtypeStruct((1, Bp), jnp.int32),
            grid=grid,
            in_specs=in_specs,
            out_specs=out_spec,
            compiler_params=cparams,
            cost_estimate=cost,
        )(x, w, b_col)
        return preds[0, :B]

    y = labels.astype(jnp.int32).reshape(1, B)
    if Bp != B:
        y = jnp.pad(y, ((0, 0), (0, Bp - B)))    # O(B) int32 pad, negligible
    cost = pl.CostEstimate(flops=2 * B * H * L + 10 * B * L,
                           transcendentals=3 * B * L,
                           bytes_accessed=base_bytes + 2 * Bp * 4)
    per_sample = pl.pallas_call(
        functools.partial(_fused_ce_kernel, total_rows=B),
        out_shape=jax.ShapeDtypeStruct((1, Bp), jnp.float32),
        grid=grid,
        in_specs=in_specs + [pl.BlockSpec((1, tb), lambda i: (0, i))],
        out_specs=out_spec,
        compiler_params=cparams,
        cost_estimate=cost,
    )(x, w, b_col, y)
    # Mean over the TRUE batch; padded/garbage lanes were zeroed in-kernel.
    return jnp.sum(per_sample) / B


def init_params(key, hidden_size=HIDDEN_SIZE, num_labels=NUM_LABELS):
    # deterministic nn.Linear-style init (uniform in +-1/sqrt(fan_in))
    kw, kb = jax.random.split(key)
    bound = 1.0 / jnp.sqrt(hidden_size)
    weight = jax.random.uniform(kw, (num_labels, hidden_size), jnp.float32, -bound, bound)
    bias = jax.random.uniform(kb, (num_labels,), jnp.float32, -bound, bound)
    return weight, bias


def _reference(hidden, weight, bias, labels=None):
    logits = jnp.tanh(
        jnp.dot(hidden.astype(jnp.bfloat16), weight.T.astype(jnp.bfloat16),
                preferred_element_type=jnp.float32) + bias)
    if labels is None:
        return jnp.argmax(logits, axis=-1).astype(jnp.int32)
    picked = jnp.take_along_axis(logits, labels[:, None].astype(jnp.int32), axis=-1)[:, 0]
    return jnp.mean(jax.nn.logsumexp(logits, axis=-1) - picked)


if __name__ == "__main__":
    key = jax.random.PRNGKey(0)
    k_param, k_hidden, k_label = jax.random.split(key, 3)

    weight, bias = init_params(k_param)
    hidden = jax.random.normal(k_hidden, (BATCH, HIDDEN_SIZE), jnp.float32)
    labels = jax.random.randint(k_label, (BATCH,), 0, NUM_LABELS, jnp.int32)

    # --- small batch: single padded tile, tail masking inside the tile ---
    preds = jax.block_until_ready(sequence_summary(hidden, weight, bias))
    loss = jax.block_until_ready(sequence_summary(hidden, weight, bias, labels=labels))

    ref_preds = _reference(hidden, weight, bias)
    ref_loss = _reference(hidden, weight, bias, labels)
    assert preds.shape == (BATCH,)
    assert jnp.array_equal(preds, ref_preds), (preds, ref_preds)
    assert jnp.allclose(loss, ref_loss, rtol=1e-4, atol=1e-4), (loss, ref_loss)

    # --- larger batch: grid of 2 ("parallel"), un-padded x with partial last block ---
    B2 = 272
    hidden2 = jax.random.normal(jax.random.PRNGKey(1), (B2, HIDDEN_SIZE), jnp.float32)
    labels2 = jax.random.randint(jax.random.PRNGKey(2), (B2,), 0, NUM_LABELS, jnp.int32)
    preds2 = jax.block_until_ready(sequence_summary(hidden2, weight, bias))
    loss2 = jax.block_until_ready(sequence_summary(hidden2, weight, bias, labels=labels2))
    ref_preds2 = _reference(hidden2, weight, bias)
    ref_loss2 = _reference(hidden2, weight, bias, labels2)
    assert preds2.shape == (B2,)
    assert jnp.array_equal(preds2, ref_preds2), (preds2, ref_preds2)
    assert jnp.allclose(loss2, ref_loss2, rtol=1e-4, atol=1e-4), (loss2, ref_loss2)

    print("KERNEL_OK")
</pallas_src>

<mosaic_0001>
module attributes {stable_mosaic.version = 11 : i64} {
  func.func @_fused_argmax_kernel(%arg0: i32, %arg1: memref<16x128xf32, #tpu.memory_space<vmem>>, %arg2: memref<2x128xf32, #tpu.memory_space<vmem>>, %arg3: memref<2x1xf32, #tpu.memory_space<vmem>>, %arg4: memref<1x16xi32, #tpu.memory_space<vmem>>) attributes {dimension_semantics = [#tpu.dimension_semantics<parallel>], iteration_bounds = array<i64: 1>, scalar_prefetch = 0 : i64, scratch_operands = 0 : i64, tpu.core_type = #tpu.core_type<tc>, window_params = [{transform_indices = @transform_0, window_bounds = array<i64: 16, 128>}, {pipeline_mode = #tpu.pipeline_mode<synchronous>, transform_indices = @transform_1, window_bounds = array<i64: 2, 128>}, {pipeline_mode = #tpu.pipeline_mode<synchronous>, transform_indices = @transform_2, window_bounds = array<i64: 2, 1>}, {transform_indices = @transform_3, window_bounds = array<i64: 1, 16>}]} {
    %c0 = arith.constant 0 : index
    %c0_0 = arith.constant 0 : index
    %0 = vector.load %arg1[%c0, %c0_0] : memref<16x128xf32, #tpu.memory_space<vmem>>, vector<16x128xf32>
    %1 = arith.truncf %0 : vector<16x128xf32> to vector<16x128xbf16>
    %c0_1 = arith.constant 0 : index
    %c0_2 = arith.constant 0 : index
    %2 = vector.load %arg2[%c0_1, %c0_2] : memref<2x128xf32, #tpu.memory_space<vmem>>, vector<2x128xf32>
    %3 = arith.truncf %2 : vector<2x128xf32> to vector<2x128xbf16>
    %cst = arith.constant dense<0.000000e+00> : vector<2x16xf32>
    %4 = tpu.matmul %3, %1, %cst {dimension_numbers = #tpu.dot_dimension_numbers<[1], [1], [0], [0], [0, 0, 1, 0], [], []>} : vector<2x128xbf16>, vector<16x128xbf16>, vector<2x16xf32> -> vector<2x16xf32>
    %c0_3 = arith.constant 0 : index
    %c0_4 = arith.constant 0 : index
    %5 = vector.load %arg3[%c0_3, %c0_4] : memref<2x1xf32, #tpu.memory_space<vmem>>, vector<2x1xf32>
    %6 = vector.broadcast %5 : vector<2x1xf32> to vector<2x16xf32>
    %7 = arith.addf %4, %6 : vector<2x16xf32>
    %8 = math.tanh %7 : vector<2x16xf32>
    %cst_5 = arith.constant dense<0xFF800000> : vector<16xf32>
    %9 = vector.multi_reduction <maximumf>, %8, %cst_5 [0] : vector<2x16xf32> to vector<16xf32>
    %10 = vector.shape_cast %9 : vector<16xf32> to vector<1x16xf32>
    %11 = tpu.iota {dimensions = array<i32: 0>} : vector<2x16xi32>
    %12 = vector.broadcast %10 : vector<1x16xf32> to vector<2x16xf32>
    %13 = arith.cmpf oeq, %8, %12 : vector<2x16xf32>
    %c2_i32 = arith.constant 2 : i32
    %14 = vector.broadcast %c2_i32 : i32 to vector<2x16xi32>
    %15 = arith.select %13, %11, %14 : vector<2x16xi1>, vector<2x16xi32>
    %cst_6 = arith.constant dense<2147483647> : vector<16xi32>
    %16 = vector.multi_reduction <minsi>, %15, %cst_6 [0] : vector<2x16xi32> to vector<16xi32>
    %17 = vector.shape_cast %16 : vector<16xi32> to vector<1x16xi32>
    %c0_7 = arith.constant 0 : index
    %c0_8 = arith.constant 0 : index
    %18 = vector.load %arg4[%c0_7, %c0_8] : memref<1x16xi32, #tpu.memory_space<vmem>>, vector<1x16xi32>
    tpu.vector_store %arg4[%c0_7, %c0_8], %17 {strides = array<i32>} : memref<1x16xi32, #tpu.memory_space<vmem>>, vector<1x16xi32>,
    return
  }
  func.func @transform_0(%arg0: i32) -> (i32, i32) {
    %c0_i32 = arith.constant 0 : i32
    %c0_i32_0 = arith.constant 0 : i32
    return %arg0, %c0_i32 : i32, i32
  }
  func.func @transform_1(%arg0: i32) -> (i32, i32) {
    %c0_i32 = arith.constant 0 : i32
    %c0_i32_0 = arith.constant 0 : i32
    %c0_i32_1 = arith.constant 0 : i32
    return %c0_i32, %c0_i32_0 : i32, i32
  }
  func.func @transform_2(%arg0: i32) -> (i32, i32) {
    %c0_i32 = arith.constant 0 : i32
    %c0_i32_0 = arith.constant 0 : i32
    %c0_i32_1 = arith.constant 0 : i32
    return %c0_i32, %c0_i32_0 : i32, i32
  }
  func.func @transform_3(%arg0: i32) -> (i32, i32) {
    %c0_i32 = arith.constant 0 : i32
    %c0_i32_0 = arith.constant 0 : i32
    return %c0_i32, %arg0 : i32, i32
  }
}

</mosaic_0001>

<bundles_post_ra>
// kernel: tpu_custom_call.1
= control target key start
LH: loop header
LB: loop body
LE: loop exit
PB: predicated region body
PF: predicated region fallthrough
CT: control target
= control target key end

     0   :  { %8 = vsyncpa [#allocation3], 0  ;;  %s195_s0 = inlined_call_operand.hbm [shape: f32[16,128], index: 0, kind: input, shape index: {}]   ;;  %s196_s1 = inlined_call_operand.vmem [shape: f32[2,128], index: 1, kind: input, shape index: {}]   ;;  %s197_s2 = inlined_call_operand.vmem [shape: f32[2,1], index: 2, kind: input, shape index: {}]   ;;  %s198_s3 = inlined_call_operand.hbm [shape: s32[1,16], index: 3, kind: output, shape index: {}]  }
   0x1   :  { %9 = vsyncpa [#allocation4], 0  ;;  %s14_s14 = sshll.u32 %s195_s0, 4  ;;  %s158_s15 = smov [#allocation2]   ;;  %s15_s14 = int_to_ptr.hbm [resolvable:$true] %s14_s14 }
   0x2   :  { %s16_s16 = sshll.u32 %s158_s15, 4  ;;  %s159_s17 = smov 128   ;;  %s17_s16 = int_to_ptr.vmem [resolvable:$true] %s16_s16 }
   0x3   :  { %s160_s18 = smov 8  }
   0x4   :  { %22 = dma.hbm_to_vmem [thread:$0]  %s15_s14, 256, %s17_s16, [#allocation3], %s159_s17, %s159_s17, %s160_s18  }
   0x5   :  { %154 = dma.done.wait [#allocation3], 256  }
   0x6   :  { %155 = vsyncadd [#allocation3], 4294967040  ;;  %v161_v0 = vmov 0   ;;  %v32_v1 = vld [vmem:[#allocation2] sm:$0xff]  ;;  %v33_v2 = vld [vmem:[#allocation2 + $0x8] sm:$0xff]  ;;  %vm57_vm0 = vcmask 123904   ;;  %v65_v16 = vlaneseq }
   0x7   :  { %103 = vset.pattern.permute.xlu0 %v161_v0  ;;  %v34_v3 = vpack.c.bf16 %v33_v2, %v32_v1  ;;  %v37_v4 = vld [vmem:[%s197_s2] sm:$0x3]  ;;  %s88_s24 = sshll.u32 %s198_s3, 4  ;;  %vm79_vm4 = vcmask 122880   ;;  %s89_s24 = int_to_ptr.hbm [resolvable:$true] %s88_s24 }
   0x8   :  { %40 = vperm.xlu0 %103, %v37_v4   ;;  %v35_v5 = vld [vmem:[%s196_s1] sm:$0x3]  ;;  %v66_v19 = vshrl.u32 %v65_v16, 7  ;;  %s162_s1 = smov [#allocation5]  }
   0x9   :  { %50 = vmatpush.bf16.xpose.msra.mxu0 %v34_v3  ;;  %v36_v6 = vpack.c.bf16 %v35_v5, %v35_v5  ;;  %s86_s2 = sshll.u32 %s162_s1, 4  ;;  %s87_s2 = int_to_ptr.vmem [resolvable:$true] %s86_s2 }
  0x10   :  { %51 = vmatmul.bf16.vlgmr.msra.gmra.mxu0 %v36_v6 }
  0x7a   :  { %v41_v7 = vpop.permute.xlu0 %40 }
  0x8d   :  { %v52_v8 = vpop.f32.mrf.mxu0 }
  0x8e   :  { %v53_v9 = vadd.f32 %v52_v8, %v41_v7 }
  0x90   :  { %104 = vtanh.f32 %v53_v9 }
  0x95   :  { %v54_v10 = vpop.f32.mrf.mxu0 }
  0x96   :  { %v105_v11 = vpop.eup %104 }
  0x97   :  { %v58_v12 = vsel %vm57_vm0, %v105_v11, -inf }
  0x98   :  { %v59_v13 = vrot.slane %v58_v12, 4 }
  0x9a   :  { %v60_v14 = vmax.f32 %v58_v12, %v59_v13 }
  0x9c   :  { %v61_v15 = vrot.slane %v60_v14, 2 }
  0x9e   :  { %v62_v17 = vmax.f32 %v60_v14, %v61_v15 }
  0xa0   :  { %v63_v18 = vrot.slane %v62_v17, 1 }
  0xa2   :  { %v64_v20 = vmax.f32 %v62_v17, %v63_v18 }
  0xa4   :  { %vm67_vm1 = vcmp.eq.f32.partialorder %v105_v11, %v64_v20 }
  0xa5   :  { %v68_v21 = vsel %vm67_vm1, %v66_v19, 2 }
  0xa6   :  { %v69_v22 = vsel %vm57_vm0, %v68_v21, 2147483647 }
  0xa7   :  { %v70_v23 = vrot.slane %v69_v22, 4 }
  0xa9   :  { %vm71_vm2 = vcmp.lt.s32.totalorder %v69_v22, %v70_v23 }
  0xaa   :  { %v72_v24 = vsel %vm71_vm2, %v69_v22, %v70_v23 }
  0xab   :  { %v73_v25 = vrot.slane %v72_v24, 2 }
  0xad   :  { %vm74_vm3 = vcmp.lt.s32.totalorder %v72_v24, %v73_v25 }
  0xae   :  { %v75_v26 = vsel %vm74_vm3, %v72_v24, %v73_v25 }
  0xaf   :  { %v76_v27 = vrot.slane %v75_v26, 1 }
  0xb1   :  { %vm77_vm5 = vcmp.lt.s32.totalorder %v75_v26, %v76_v27 }
  0xb2   :  { %v78_v28 = vsel %vm77_vm5, %v75_v26, %v76_v27 }
  0xb3   :  { %80 = vst.msk [vmem:[#allocation5] sm:$0x1] %vm79_vm4, %v78_v28 }
  0xb4   :  { %91 = dma.vmem_to_hbm [thread:$0]  %s87_s2, 16, %s89_s24, [#allocation4]  }
  0xb5   :  { %156 = dma.done.wait [#allocation4], 16  }
  0xb6   :  { %157 = vsyncadd [#allocation4], 4294967280 }
  0xb7   :  { %96 = vsyncpa [#allocation3], 1 }
  0xb8   :  { %97 = vsyncpa [#allocation4], 1 }

</bundles_post_ra>
